<compile_context>
chip_gen: v7x
topology: tpu7x:2x2x1
jax: 0.10.0
libtpu: 0.0.40
codegen_flags: <defaults>
</compile_context>

<pallas_src>
import numpy as np
import jax
import jax.numpy as jnp
from jax.experimental import pallas as pl
from jax.experimental.pallas import tpu as pltpu


def _round_up(n: int, m: int) -> int:
    return ((n + m - 1) // m) * m


def _log_sigmoid(x):
    # log(sigmoid(x)) = min(x, 0) - log(1 + exp(-|x|))
    # Numerically stable for very negative x (avoids sigmoid underflow ->
    # log(0) = -inf -> 0 * -inf = NaN on zero-count / padded rows).
    return jnp.minimum(x, 0.0) - jnp.log(1.0 + jnp.exp(-jnp.abs(x)))


def unigram_kernel(x_ref, s_ref, o_ref, cnt_ref, a_ref, b_ref, c_ref):
    # x_ref: (tv, tt) input tile; s_ref: (tv, 1) logits tile; o_ref: (1, 1)
    # cnt_ref: (tv, 1) f32 per-row count accumulator (per V tile)
    # a_ref, b_ref, c_ref: (1, 1) f32 scalar accumulators (whole grid)
    vi = pl.program_id(0)          # V tile index (outer)
    ti = pl.program_id(1)          # T tile index (inner, reduction-last)
    n_v = pl.num_programs(0)
    n_t = pl.num_programs(1)

    @pl.when((vi == 0) & (ti == 0))
    def _():
        a_ref[...] = jnp.zeros_like(a_ref)
        b_ref[...] = jnp.zeros_like(b_ref)
        c_ref[...] = jnp.zeros_like(c_ref)

    @pl.when(ti == 0)
    def _():
        cnt_ref[...] = jnp.zeros_like(cnt_ref)

    # Stream this (tv, tt) tile; accumulate row counts in f32 regardless of
    # the HBM dtype of x (so bf16/int8-style inputs stay exact).
    x = x_ref[...].astype(jnp.float32)
    cnt_ref[...] += jnp.sum(x, axis=1, keepdims=True)          # (tv, 1)

    # Once per V tile (after its T reduction finished), fold counts into the
    # three scalar accumulators.  s-side transcendentals run once per V tile,
    # not once per streamed block.
    @pl.when(ti == n_t - 1)
    def _():
        s = s_ref[...].astype(jnp.float32)                     # (tv, 1)
        logsig = _log_sigmoid(s)                               # (tv, 1)
        sig = jax.nn.sigmoid(s)                                # (tv, 1)
        counts = cnt_ref[...]                                  # (tv, 1)
        a_ref[...] += jnp.sum(counts * logsig, axis=0, keepdims=True)
        b_ref[...] += jnp.sum(counts, axis=0, keepdims=True)
        c_ref[...] += jnp.sum(sig, axis=0, keepdims=True)

    # Finalize: out = A - B * log(C)  ==  counts.T @ log(sigmoid(s)/sum(sigmoid(s)))
    @pl.when((vi == n_v - 1) & (ti == n_t - 1))
    def _():
        o_ref[...] = a_ref[...] - b_ref[...] * jnp.log(c_ref[...])


def unigram_forward(x: jax.Array, s: jax.Array, *,
                    tile_v: int = 512, tile_t: int = 2048) -> jax.Array:
    """x: (V, T) float, s: (V, 1) float32 -> (1, 1) float32 log-likelihood."""
    V, T = x.shape
    assert s.shape == (V, 1)

    # Lane/sublane-friendly tile sizes: tv multiple of 8, tt multiple of 128.
    tv = min(tile_v, _round_up(V, 8))
    tt = min(tile_t, _round_up(T, 128))
    tv = _round_up(tv, 8)
    tt = _round_up(tt, 128)

    Vp = _round_up(V, tv)
    Tp = _round_up(T, tt)
    if Tp != T:
        # Zero columns contribute nothing to the counts.
        x = jnp.pad(x, ((0, 0), (0, Tp - T)))
    if Vp != V:
        # Padded rows: zero counts; s padded with a very negative logit so
        # sigmoid -> 0 exactly (no contribution to C) and log_sigmoid stays
        # finite (0 * finite = 0 contribution to A).
        x = jnp.pad(x, ((0, Vp - V), (0, 0)))
        s = jnp.pad(s, ((0, Vp - V), (0, 0)), constant_values=-1e4)

    grid = (Vp // tv, Tp // tt)   # (V tiles, T tiles); T innermost / reduction-last

    itemsize = jnp.dtype(x.dtype).itemsize
    cost = pl.CostEstimate(
        flops=int(2 * Vp * Tp + 6 * Vp),
        transcendentals=int(2 * Vp),
        bytes_accessed=int(Vp * Tp * itemsize + Vp * 4 + 4),
    )

    return pl.pallas_call(
        unigram_kernel,
        out_shape=jax.ShapeDtypeStruct((1, 1), jnp.float32),
        grid_spec=pltpu.PrefetchScalarGridSpec(
            num_scalar_prefetch=0,
            grid=grid,
            in_specs=[
                pl.BlockSpec((tv, tt), lambda vi, ti: (vi, ti)),   # x tile
                pl.BlockSpec((tv, 1), lambda vi, ti: (vi, 0)),     # s tile
            ],
            out_specs=pl.BlockSpec((1, 1), lambda vi, ti: (0, 0)),
            scratch_shapes=[
                pltpu.VMEM((tv, 1), jnp.float32),   # per-V-tile counts
                pltpu.VMEM((1, 1), jnp.float32),    # A accumulator
                pltpu.VMEM((1, 1), jnp.float32),    # B accumulator
                pltpu.VMEM((1, 1), jnp.float32),    # C accumulator
            ],
        ),
        compiler_params=pltpu.CompilerParams(
            dimension_semantics=("arbitrary", "arbitrary"),
            vmem_limit_bytes=32 * 1024 * 1024,
        ),
        cost_estimate=cost,
    )(x, s)


def init_unigram_params(V: int) -> jax.Array:
    """Deterministic init matching the PyTorch module: s = logit(1/V)."""
    p0 = np.ones((V, 1), dtype=np.float64) / V
    s0 = np.log(p0) - np.log(1.0 - p0)                 # logit
    return jnp.asarray(s0.astype(np.float32))          # (V, 1)


if __name__ == "__main__":
    # Small but non-trivial shapes: exercises V/T padding and a (3, 4) grid
    # with the small tiles chosen below.
    V, T = 300, 1000

    key = jax.random.PRNGKey(0)
    tokens = jax.random.randint(key, (T,), 0, V)
    x = jax.nn.one_hot(tokens, V, dtype=jnp.float32).T      # (V, T)
    s = init_unigram_params(V)                               # (V, 1)

    out = unigram_forward(x, s, tile_v=128, tile_t=256)
    out = jax.block_until_ready(out)

    # Pure-JAX reference (matches the PyTorch forward exactly).
    sig = jax.nn.sigmoid(s)
    p = sig / jnp.sum(sig)
    ref = jnp.sum(x, axis=1, keepdims=True).T @ jnp.log(p)   # (1, 1)
    np.testing.assert_allclose(np.asarray(out), np.asarray(ref),
                               rtol=1e-4, atol=1e-4)

    print("KERNEL_OK")
</pallas_src>

<mosaic_0001>
module attributes {stable_mosaic.version = 11 : i64} {
  func.func @unigram_kernel(%arg0: i32, %arg1: i32, %arg2: memref<128x256xf32, #tpu.memory_space<vmem>>, %arg3: memref<128x1xf32, #tpu.memory_space<vmem>>, %arg4: memref<1x1xf32, #tpu.memory_space<vmem>>, %arg5: memref<128x1xf32, #tpu.memory_space<vmem>>, %arg6: memref<1x1xf32, #tpu.memory_space<vmem>>, %arg7: memref<1x1xf32, #tpu.memory_space<vmem>>, %arg8: memref<1x1xf32, #tpu.memory_space<vmem>>) attributes {dimension_semantics = [#tpu.dimension_semantics<arbitrary>, #tpu.dimension_semantics<arbitrary>], iteration_bounds = array<i64: 3, 4>, scalar_prefetch = 0 : i64, scratch_operands = 4 : i64, tpu.core_type = #tpu.core_type<tc>, window_params = [{transform_indices = @transform_0, window_bounds = array<i64: 128, 256>}, {transform_indices = @transform_1, window_bounds = array<i64: 128, 1>}, {pipeline_mode = #tpu.pipeline_mode<synchronous>, transform_indices = @transform_2, window_bounds = array<i64: 1, 1>}]} {
    %c0_i32 = arith.constant 0 : i32
    %0 = arith.cmpi eq, %arg0, %c0_i32 : i32
    %c0_i32_0 = arith.constant 0 : i32
    %1 = arith.cmpi eq, %arg1, %c0_i32_0 : i32
    %2 = arith.andi %0, %1 : i1
    %3 = arith.extui %2 : i1 to i32
    %c0_i32_1 = arith.constant 0 : i32
    %4 = arith.cmpi ne, %3, %c0_i32_1 : i32
    scf.if %4 {
      %cst_12 = arith.constant 0.000000e+00 : f32
      %22 = vector.broadcast %cst_12 : f32 to vector<1x1xf32>
      %c0_13 = arith.constant 0 : index
      %c0_14 = arith.constant 0 : index
      %23 = vector.load %arg6[%c0_13, %c0_14] : memref<1x1xf32, #tpu.memory_space<vmem>>, vector<1x1xf32>
      tpu.vector_store %arg6[%c0_13, %c0_14], %22 {strides = array<i32>} : memref<1x1xf32, #tpu.memory_space<vmem>>, vector<1x1xf32>,
      %cst_15 = arith.constant 0.000000e+00 : f32
      %24 = vector.broadcast %cst_15 : f32 to vector<1x1xf32>
      %c0_16 = arith.constant 0 : index
      %c0_17 = arith.constant 0 : index
      %25 = vector.load %arg7[%c0_16, %c0_17] : memref<1x1xf32, #tpu.memory_space<vmem>>, vector<1x1xf32>
      tpu.vector_store %arg7[%c0_16, %c0_17], %24 {strides = array<i32>} : memref<1x1xf32, #tpu.memory_space<vmem>>, vector<1x1xf32>,
      %cst_18 = arith.constant 0.000000e+00 : f32
      %26 = vector.broadcast %cst_18 : f32 to vector<1x1xf32>
      %c0_19 = arith.constant 0 : index
      %c0_20 = arith.constant 0 : index
      %27 = vector.load %arg8[%c0_19, %c0_20] : memref<1x1xf32, #tpu.memory_space<vmem>>, vector<1x1xf32>
      tpu.vector_store %arg8[%c0_19, %c0_20], %26 {strides = array<i32>} : memref<1x1xf32, #tpu.memory_space<vmem>>, vector<1x1xf32>,
    } else {
    }
    %c0_i32_2 = arith.constant 0 : i32
    %5 = arith.cmpi eq, %arg1, %c0_i32_2 : i32
    %6 = arith.extui %5 : i1 to i32
    %c0_i32_3 = arith.constant 0 : i32
    %7 = arith.cmpi ne, %6, %c0_i32_3 : i32
    scf.if %7 {
      %cst_12 = arith.constant 0.000000e+00 : f32
      %22 = vector.broadcast %cst_12 : f32 to vector<128x1xf32>
      %c0_13 = arith.constant 0 : index
      %c0_14 = arith.constant 0 : index
      %23 = vector.load %arg5[%c0_13, %c0_14] : memref<128x1xf32, #tpu.memory_space<vmem>>, vector<128x1xf32>
      tpu.vector_store %arg5[%c0_13, %c0_14], %22 {strides = array<i32>} : memref<128x1xf32, #tpu.memory_space<vmem>>, vector<128x1xf32>,
    } else {
    }
    %c0 = arith.constant 0 : index
    %c0_4 = arith.constant 0 : index
    %8 = vector.load %arg2[%c0, %c0_4] : memref<128x256xf32, #tpu.memory_space<vmem>>, vector<128x256xf32>
    %c0_5 = arith.constant 0 : index
    %c0_6 = arith.constant 0 : index
    %9 = vector.load %arg5[%c0_5, %c0_6] : memref<128x1xf32, #tpu.memory_space<vmem>>, vector<128x1xf32>
    %cst = arith.constant dense<0.000000e+00> : vector<128xf32>
    %10 = vector.multi_reduction <add>, %8, %cst [1] : vector<128x256xf32> to vector<128xf32>
    %11 = vector.shape_cast %10 : vector<128xf32> to vector<128x1xf32>
    %12 = arith.addf %9, %11 : vector<128x1xf32>
    %c0_7 = arith.constant 0 : index
    %c0_8 = arith.constant 0 : index
    %13 = vector.load %arg5[%c0_7, %c0_8] : memref<128x1xf32, #tpu.memory_space<vmem>>, vector<128x1xf32>
    tpu.vector_store %arg5[%c0_7, %c0_8], %12 {strides = array<i32>} : memref<128x1xf32, #tpu.memory_space<vmem>>, vector<128x1xf32>,
    %c3_i32 = arith.constant 3 : i32
    %14 = arith.cmpi eq, %arg1, %c3_i32 : i32
    %15 = arith.extui %14 : i1 to i32
    %c0_i32_9 = arith.constant 0 : i32
    %16 = arith.cmpi ne, %15, %c0_i32_9 : i32
    scf.if %16 {
      %c0_12 = arith.constant 0 : index
      %c0_13 = arith.constant 0 : index
      %22 = vector.load %arg3[%c0_12, %c0_13] : memref<128x1xf32, #tpu.memory_space<vmem>>, vector<128x1xf32>
      %cst_14 = arith.constant 0.000000e+00 : f32
      %23 = vector.broadcast %cst_14 : f32 to vector<128x1xf32>
      %24 = arith.minimumf %22, %23 : vector<128x1xf32>
      %25 = math.absf %22 : vector<128x1xf32>
      %cst_15 = arith.constant 0.000000e+00 : f32
      %26 = vector.broadcast %cst_15 : f32 to vector<128x1xf32>
      %27 = arith.subf %26, %25 : vector<128x1xf32>
      %28 = math.exp %27 : vector<128x1xf32>
      %cst_16 = arith.constant 1.000000e+00 : f32
      %29 = vector.broadcast %cst_16 : f32 to vector<128x1xf32>
      %30 = arith.addf %29, %28 : vector<128x1xf32>
      %31 = math.log %30 : vector<128x1xf32>
      %32 = arith.subf %24, %31 : vector<128x1xf32>
      %33 = arith.negf %22 : vector<128x1xf32>
      %34 = math.exp %33 : vector<128x1xf32>
      %cst_17 = arith.constant 1.000000e+00 : f32
      %35 = vector.broadcast %cst_17 : f32 to vector<128x1xf32>
      %36 = arith.addf %35, %34 : vector<128x1xf32>
      %37 = arith.divf %35, %36 : vector<128x1xf32>
      %c0_18 = arith.constant 0 : index
      %c0_19 = arith.constant 0 : index
      %38 = vector.load %arg5[%c0_18, %c0_19] : memref<128x1xf32, #tpu.memory_space<vmem>>, vector<128x1xf32>
      %c0_20 = arith.constant 0 : index
      %c0_21 = arith.constant 0 : index
      %39 = vector.load %arg6[%c0_20, %c0_21] : memref<1x1xf32, #tpu.memory_space<vmem>>, vector<1x1xf32>
      %40 = arith.mulf %38, %32 : vector<128x1xf32>
      %cst_22 = arith.constant dense<0.000000e+00> : vector<1xf32>
      %41 = vector.multi_reduction <add>, %40, %cst_22 [0] : vector<128x1xf32> to vector<1xf32>
      %42 = vector.shape_cast %41 : vector<1xf32> to vector<1x1xf32>
      %43 = arith.addf %39, %42 : vector<1x1xf32>
      %c0_23 = arith.constant 0 : index
      %c0_24 = arith.constant 0 : index
      %44 = vector.load %arg6[%c0_23, %c0_24] : memref<1x1xf32, #tpu.memory_space<vmem>>, vector<1x1xf32>
      tpu.vector_store %arg6[%c0_23, %c0_24], %43 {strides = array<i32>} : memref<1x1xf32, #tpu.memory_space<vmem>>, vector<1x1xf32>,
      %c0_25 = arith.constant 0 : index
      %c0_26 = arith.constant 0 : index
      %45 = vector.load %arg7[%c0_25, %c0_26] : memref<1x1xf32, #tpu.memory_space<vmem>>, vector<1x1xf32>
      %cst_27 = arith.constant dense<0.000000e+00> : vector<1xf32>
      %46 = vector.multi_reduction <add>, %38, %cst_27 [0] : vector<128x1xf32> to vector<1xf32>
      %47 = vector.shape_cast %46 : vector<1xf32> to vector<1x1xf32>
      %48 = arith.addf %45, %47 : vector<1x1xf32>
      %c0_28 = arith.constant 0 : index
      %c0_29 = arith.constant 0 : index
      %49 = vector.load %arg7[%c0_28, %c0_29] : memref<1x1xf32, #tpu.memory_space<vmem>>, vector<1x1xf32>
      tpu.vector_store %arg7[%c0_28, %c0_29], %48 {strides = array<i32>} : memref<1x1xf32, #tpu.memory_space<vmem>>, vector<1x1xf32>,
      %c0_30 = arith.constant 0 : index
      %c0_31 = arith.constant 0 : index
      %50 = vector.load %arg8[%c0_30, %c0_31] : memref<1x1xf32, #tpu.memory_space<vmem>>, vector<1x1xf32>
      %cst_32 = arith.constant dense<0.000000e+00> : vector<1xf32>
      %51 = vector.multi_reduction <add>, %37, %cst_32 [0] : vector<128x1xf32> to vector<1xf32>
      %52 = vector.shape_cast %51 : vector<1xf32> to vector<1x1xf32>
      %53 = arith.addf %50, %52 : vector<1x1xf32>
      %c0_33 = arith.constant 0 : index
      %c0_34 = arith.constant 0 : index
      %54 = vector.load %arg8[%c0_33, %c0_34] : memref<1x1xf32, #tpu.memory_space<vmem>>, vector<1x1xf32>
      tpu.vector_store %arg8[%c0_33, %c0_34], %53 {strides = array<i32>} : memref<1x1xf32, #tpu.memory_space<vmem>>, vector<1x1xf32>,
    } else {
    }
    %c2_i32 = arith.constant 2 : i32
    %17 = arith.cmpi eq, %arg0, %c2_i32 : i32
    %c3_i32_10 = arith.constant 3 : i32
    %18 = arith.cmpi eq, %arg1, %c3_i32_10 : i32
    %19 = arith.andi %17, %18 : i1
    %20 = arith.extui %19 : i1 to i32
    %c0_i32_11 = arith.constant 0 : i32
    %21 = arith.cmpi ne, %20, %c0_i32_11 : i32
    scf.if %21 {
      %c0_12 = arith.constant 0 : index
      %c0_13 = arith.constant 0 : index
      %22 = vector.load %arg6[%c0_12, %c0_13] : memref<1x1xf32, #tpu.memory_space<vmem>>, vector<1x1xf32>
      %c0_14 = arith.constant 0 : index
      %c0_15 = arith.constant 0 : index
      %23 = vector.load %arg7[%c0_14, %c0_15] : memref<1x1xf32, #tpu.memory_space<vmem>>, vector<1x1xf32>
      %c0_16 = arith.constant 0 : index
      %c0_17 = arith.constant 0 : index
      %24 = vector.load %arg8[%c0_16, %c0_17] : memref<1x1xf32, #tpu.memory_space<vmem>>, vector<1x1xf32>
      %25 = math.log %24 : vector<1x1xf32>
      %26 = arith.mulf %23, %25 : vector<1x1xf32>
      %27 = arith.subf %22, %26 : vector<1x1xf32>
      %c0_18 = arith.constant 0 : index
      %c0_19 = arith.constant 0 : index
      %28 = vector.load %arg4[%c0_18, %c0_19] : memref<1x1xf32, #tpu.memory_space<vmem>>, vector<1x1xf32>
      tpu.vector_store %arg4[%c0_18, %c0_19], %27 {strides = array<i32>} : memref<1x1xf32, #tpu.memory_space<vmem>>, vector<1x1xf32>,
    } else {
    }
    return
  }
  func.func @transform_0(%arg0: i32, %arg1: i32) -> (i32, i32) {
    %c0_i32 = arith.constant 0 : i32
    return %arg0, %arg1 : i32, i32
  }
  func.func @transform_1(%arg0: i32, %arg1: i32) -> (i32, i32) {
    %c0_i32 = arith.constant 0 : i32
    %c0_i32_0 = arith.constant 0 : i32
    return %arg0, %c0_i32 : i32, i32
  }
  func.func @transform_2(%arg0: i32, %arg1: i32) -> (i32, i32) {
    %c0_i32 = arith.constant 0 : i32
    %c0_i32_0 = arith.constant 0 : i32
    %c0_i32_1 = arith.constant 0 : i32
    return %c0_i32, %c0_i32_0 : i32, i32
  }
}

</mosaic_0001>

<bundles_post_ra>
// kernel: tpu_custom_call.1
= control target key start
LH: loop header
LB: loop body
LE: loop exit
PB: predicated region body
PF: predicated region fallthrough
CT: control target
= control target key end

     0   :  { %7 = vsyncpa [#allocation7], 0  ;;  %s1798_s0 = inlined_call_operand.hbm [shape: f32[384,1024], index: 0, kind: input, shape index: {}]   ;;  %s1799_s1 = inlined_call_operand.vmem [shape: f32[384,1], index: 1, kind: input, shape index: {}]   ;;  %s1800_s2 = inlined_call_operand.hbm [shape: f32[1,1], index: 2, kind: output, shape index: {}]  }
   0x1   :  { %9 = vsyncpa [#allocation7 + $0x1], 0 }
   0x2   :  { %10 = vsyncpa [#allocation8], 0  ;;  %s1259_s9 = smov 0   ;;  %s1261_s10 = smov 0  }
   0x3   :  { %s1263_s11 = smov 0   ;;  %s1265_s12 = smov 0  }
   0x4   :  { %s1267_s13 = smov 0   ;;  %s1269_s14 = smov 0  }
   0x5   :  { %s1271_s15 = smov 0   ;;  %s1273_s16 = smov 0  }
   0x6 LB: > { %s861_s17 = sadd.s32 4294967295, %s1235_s16   ;;  %s25_s18 = sadd.s32 1, %s1227_s14  ;;  %s1235_s16 = sphi %s1273_s16, %s16_s16   ;;  %s1231_s15 = sphi %s1271_s15, %s1846_s15   ;;  %s1227_s14 = sphi %s1269_s14, %s1845_s14   ;;  %s1223_s13 = sphi %s1267_s13, %s1844_s13   ;;  %s1219_s12 = sphi %s1265_s12, %s1843_s12   ;;  %s1215_s11 = sphi %s1263_s11, %s1842_s11   ;;  %s1211_s10 = sphi %s1261_s10, %s1841_s10   ;;  %s1207_s9 = sphi %s1259_s9, %s1840_s9  }
   0x7   : > { %p26_p0 = scmp.ge.s32.totalorder %s25_s18, 4  ;;  %s28_s19 = sadd.s32 1, %s1231_s15 }
   0x8   : > { %s37_s20 = sadd.s32 1, %s1215_s11  ;;  %p44_p1 = scmp.ne.s32.totalorder %s1215_s11, %s1211_s10 }
   0x9   : > { %s1848_s18 = smov (%p26_p0, %s25_s18), 0  ;;  %s1850_s19 = smov (!%p26_p0, %s28_s19), %s1231_s15 }
   0xa   : > { %s33_s21 = ssub.s32 %s1227_s14, %s1848_s18  ;;  %p45_p2 = scmp.eq.s32.totalorder %s1235_s16, 0 }
   0xb   : > { %p30_p3 = scmp.ge.s32.totalorder %s1850_s19, 3  ;;  %p50_p4 = scmp.ne.s32.totalorder %s1211_s10, %s1207_s9 }
   0xc   : > { %p1310_p5 = por %p45_p2, %p44_p1  ;;  %p51_p6 = scmp.eq.s32.totalorder %s861_s17, 0 }
   0xd   : > { %s1852_s19 = smov (%p30_p3, %s1850_s19), 0  ;;  %p906_p8 = scmp.lt.s32.totalorder %s1235_s16, 12 }
   0xe   : > { %p1318_p7 = por %p51_p6, %p50_p4  ;;  %s32_s24 = ssub.s32 %s1231_s15, %s1852_s19 }
   0xf   : > { %s34_s25 = sor.u32 %s33_s21, %s32_s24  ;;  %s121_s26 = sand.u32 1, %s1215_s11  }
  0x10   : > { %p35_p9 = scmp.eq.s32.totalorder %s34_s25, 0  ;;  %s864_s27 = sshll.u32 %s121_s26, 8 }
  0x11   : > { %s866_s28 = sshll.u32 %s1227_s14, 1  ;;  %s895_s30 = sshll.u32 %s1231_s15, 7 }
  0x12   : > { %s1328_s29 = scalar_select %p35_p9, %s1215_s11, %s37_s20  }
  0x13   : > { %s132_s3 = sadd.s32 %s895_s30, %s866_s28  ;;  %s125_s4 = scalar_lea.vmem [#allocation6], %s864_s27 }
  0x14   : > { %s135_s5 = sshll.u32 %s125_s4, 4  ;;  %s868_s6 = sshll.u32 %s132_s3, 7  ;;  %s1331_s5 = int_to_ptr.vmem [resolvable:$true] %s135_s5 }
  0x15   : > { %s1336_s9 = scalar_lea.hbm %s1798_s0, %s868_s6  ;;  %p1342_p10 = pnand %p906_p8, %p1310_p5 }
  0x16   : > { %s1346_s21 = scalar_lea.sflag [#allocation7], %s121_s26  ;;  %s1109_s24 = scalar_lea.hbm %s1336_s9, 4096 }
  0x17   : > { %p1110_p11 = scmp.ne.s32.totalorder %s1336_s9, %s1109_s24  ;;  %p1111_p12 = pneg %p1342_p10 }
  0x18   : > { %s1114_s27 = scalar_lea.hbm %s1798_s0, 49152  ;;  %p1115_p1 = scmp.lt.u32.totalorder %s1336_s9, %s1798_s0 }
  0x19   : > { %p1112_p13 = pnand %p1111_p12, %p1110_p11  ;;  %p1116_p2 = scmp.lt.u32.totalorder %s1114_s27, %s1109_s24 }
  0x1a   : > { %p1118_p4 = scmp.lt.u32.totalorder %s1109_s24, %s1336_s9 }
  0x1b   : > { %p1113_p0 = pneg %p1112_p13  ;;  %p1117_p3 = por %p1116_p2, %p1115_p1 }
  0x1d   : > { %p1119_p5 = por %p1118_p4, %p1117_p3 }
  0x1f   : > { %p1120_p6 = pnand %p1119_p5, %p1113_p0 }
  0x21   : > { %1123 = shalt.err (!%p1120_p6)
}
  0x22   : > { %s1124_s26 = scalar_lea.vmem %s1331_s5, 4096  ;;  %s1237_s3 = smov [#allocation6]  }
  0x23   : > { %p1125_p8 = scmp.ne.s32.totalorder %s1331_s5, %s1124_s26  ;;  %s1129_s4 = sshll.u32 %s1237_s3, 4  ;;  %s1130_s4 = int_to_ptr.vmem [resolvable:$false] %s1129_s4 }
  0x24   : > { %s1131_s6 = scalar_lea.vmem %s1130_s4, 8192  ;;  %p1132_p13 = scmp.lt.s32.totalorder %s1331_s5, %s1130_s4 }
  0x25   : > { %p1127_p9 = pnand %p1125_p8, %p1111_p12  ;;  %p1133_p1 = scmp.lt.s32.totalorder %s1131_s6, %s1124_s26 }
  0x27   : > { %p1128_p11 = pneg %p1127_p9  ;;  %p1134_p2 = por %p1133_p1, %p1132_p13 }
  0x29   : > { %p1135_p3 = pnand %p1134_p2, %p1128_p11 }
  0x2b   : > { %1138 = shalt.err (!%p1135_p3)
}
  0x2c   : > { %s1238_s7 = smov 1024   ;;  %s1239_s8 = smov 256  }
  0x2d   : > { %s1240_s24 = smov 16   ;;  %p869_p12 = scmp.ge.s32.totalorder %s1235_s16, 1 }
  0x2e   : > { %905 = dma.hbm_to_vmem [thread:$0]  (!%p1342_p10), %s1336_s9, 4096, %s1331_s5, %s1346_s21, %s1238_s7, %s1239_s8, %s1240_s24  }
  0x2f   : > { %p152_p0 = scmp.lt.s32.totalorder %s1235_s16, 13 }
  0x31   : > { %p153_p4 = pnand %p869_p12, %p152_p0 }
  0x32   : > { %s158_s22 = sand.u32 (!%p153_p4), 1, %s1211_s10  }
  0x33   : > { %156 = sbr.rel (%p153_p4) target bundleno = 424 (0x1a8), region = 28  ;;  %s870_s25 = sshll.u32 (!%p153_p4), %s158_s22, 8 }
  0x34   : > { %s159_s27 = scalar_lea.sflag (!%p153_p4), [#allocation7], %s158_s22  ;;  %s1377_s28 = scalar_lea.vmem (!%p153_p4), [#allocation6], %s870_s25 }
  0x3a   : > { %1198 = dma.done.wait (%p1318_p7), %s159_s27, 4096  }
  0x3b   : > { %1200 = vsyncadd (%p1318_p7), %s159_s27, 4294963200  ;;  %s871_s5 = sshll.u32 %s1223_s13, 4  ;;  %p191_p10 = scmp.eq.s32.totalorder %s1223_s13, 0 }
  0x3c   : > { %p186_p5 = scmp.lt.s32.totalorder %s871_s5, 47  ;;  %p192_p6 = scmp.eq.s32.totalorder %s1219_s12, 0 }
  0x3e   : > { %s1854_s5 = smov (!%p186_p5, %s871_s5), 47  ;;  %p193_p8 = pnand %p192_p6, %p191_p10 }
  0x3f   : > { %s872_s9 = sshll.u32 %s1854_s5, 3  ;;  %vm197_vm0 = vcmask (!%p193_p8), 0   ;;  %v1241_v0 = vmov (!%p193_p8), 0.0  }
  0x40   : > { %s1389_s30 = scalar_lea.vmem %s1799_s1, %s872_s9  ;;  %196 = sbr.rel (%p193_p8) target bundleno = 71 (0x47), region = 36  ;;  %198 = vst.msk [vmem:[#allocation3] sm:$0x1] (!%p193_p8), %vm197_vm0, %v1241_v0  ;;  %199 = vst.msk [vmem:[#allocation4] sm:$0x1] (!%p193_p8), %vm197_vm0, %v1241_v0 }
  0x41   : > { %200 = vst.msk [vmem:[#allocation5] sm:$0x1] (!%p193_p8), %vm197_vm0, %v1241_v0 }
  0x47 PF: > { %p873_p7 = scmp.ne.s32.totalorder %s1219_s12, 0 }
  0x48   : > { %vm204_vm1 = vcmask (!%p873_p7), 7168   ;;  %v1242_v1 = vmov (!%p873_p7), 0.0  }
  0x49   : > { %203 = sbr.rel (%p873_p7) target bundleno = 81 (0x51), region = 40  ;;  %205 = vst.msk [vmem:[#allocation2] sm:$0xff] (!%p873_p7), %vm204_vm1, %v1242_v1  ;;  %206 = vst.msk [vmem:[#allocation2 + $0x8] sm:$0xff] (!%p873_p7), %vm204_vm1, %v1242_v1 }
  0x4a   : > { %207 = vst.msk [vmem:[#allocation2 + $0x10] sm:$0xff] (!%p873_p7), %vm204_vm1, %v1242_v1  ;;  %208 = vst.msk [vmem:[#allocation2 + $0x18] sm:$0xff] (!%p873_p7), %vm204_vm1, %v1242_v1 }
  0x4b   : > { %209 = vst.msk [vmem:[#allocation2 + $0x20] sm:$0xff] (!%p873_p7), %vm204_vm1, %v1242_v1  ;;  %210 = vst.msk [vmem:[#allocation2 + $0x28] sm:$0xff] (!%p873_p7), %vm204_vm1, %v1242_v1 }
  0x4c   : > { %211 = vst.msk [vmem:[#allocation2 + $0x30] sm:$0xff] (!%p873_p7), %vm204_vm1, %v1242_v1  ;;  %212 = vst.msk [vmem:[#allocation2 + $0x38] sm:$0xff] (!%p873_p7), %vm204_vm1, %v1242_v1 }
  0x4d   : > { %213 = vst.msk [vmem:[#allocation2 + $0x40] sm:$0xff] (!%p873_p7), %vm204_vm1, %v1242_v1  ;;  %214 = vst.msk [vmem:[#allocation2 + $0x48] sm:$0xff] (!%p873_p7), %vm204_vm1, %v1242_v1 }
  0x4e   : > { %215 = vst.msk [vmem:[#allocation2 + $0x50] sm:$0xff] (!%p873_p7), %vm204_vm1, %v1242_v1  ;;  %216 = vst.msk [vmem:[#allocation2 + $0x58] sm:$0xff] (!%p873_p7), %vm204_vm1, %v1242_v1 }
  0x4f   : > { %217 = vst.msk [vmem:[#allocation2 + $0x60] sm:$0xff] (!%p873_p7), %vm204_vm1, %v1242_v1  ;;  %218 = vst.msk [vmem:[#allocation2 + $0x68] sm:$0xff] (!%p873_p7), %vm204_vm1, %v1242_v1 }
  0x50   : > { %219 = vst.msk [vmem:[#allocation2 + $0x70] sm:$0xff] %vm204_vm1, %v1242_v1  ;;  %220 = vst.msk [vmem:[#allocation2 + $0x78] sm:$0xff] %vm204_vm1, %v1242_v1 }
  0x51 PF: > { %v225_v2 = vld [vmem:[%s1377_s28 + $0x20] sm:$0xff]  ;;  %v226_v3 = vld [vmem:[%s1377_s28 + $0x28] sm:$0xff]  ;;  %v227_v7 = vld [vmem:[%s1377_s28 + $0x30] sm:$0xff]  ;;  %p350_p9 = scmp.eq.s32.totalorder %s1219_s12, 3  ;;  %vm333_vm2 = vcmask 7168   ;;  %p874_p11 = scmp.ne.s32.totalorder %s1219_s12, 3 }
  0x52   : > { %v221_v4 = vld [vmem:[%s1377_s28] sm:$0xff]  ;;  %v275_v5 = vadd.f32 %v226_v3, %v225_v2  ;;  %v222_v6 = vld [vmem:[%s1377_s28 + $0x8] sm:$0xff]  ;;  %v228_v8 = vld [vmem:[%s1377_s28 + $0x38] sm:$0xff] }
  0x53   : > { %v269_v9 = vadd.f32 %v222_v6, %v221_v4  ;;  %v223_v10 = vld [vmem:[%s1377_s28 + $0x10] sm:$0xff]  ;;  %v224_v11 = vld [vmem:[%s1377_s28 + $0x18] sm:$0xff]  ;;  %v278_v12 = vadd.f32 %v228_v8, %v227_v7  ;;  %v229_v16 = vld [vmem:[%s1377_s28 + $0x40] sm:$0xff] }
  0x54   : > { %276 = vadd.xlane.f32.xlu1 %v275_v5  ;;  %v272_v13 = vadd.f32 %v224_v11, %v223_v10  ;;  %v231_v14 = vld [vmem:[%s1377_s28 + $0x50] sm:$0xff]  ;;  %v232_v15 = vld [vmem:[%s1377_s28 + $0x58] sm:$0xff]  ;;  %v230_v17 = vld [vmem:[%s1377_s28 + $0x48] sm:$0xff] }
  0x55   : > { %270 = vadd.xlane.f32.xlu0 %v269_v9  ;;  %v284_v18 = vadd.f32 %v232_v15, %v231_v14  ;;  %v281_v19 = vadd.f32 %v230_v17, %v229_v16  ;;  %v235_v20 = vld [vmem:[%s1377_s28 + $0x70] sm:$0xff]  ;;  %v236_v21 = vld [vmem:[%s1377_s28 + $0x78] sm:$0xff]  ;;  %v233_v22 = vld [vmem:[%s1377_s28 + $0x60] sm:$0xff] }
  0x56   : > { %v234_v23 = vld [vmem:[%s1377_s28 + $0x68] sm:$0xff]  ;;  %v290_v24 = vadd.f32 %v236_v21, %v235_v20  ;;  %v239_v26 = vld [vmem:[%s1377_s28 + $0x90] sm:$0xff]  ;;  %v240_v27 = vld [vmem:[%s1377_s28 + $0x98] sm:$0xff] }
  0x57   : > { %v287_v25 = vadd.f32 %v234_v23, %v233_v22  ;;  %v237_v28 = vld [vmem:[%s1377_s28 + $0x80] sm:$0xff]  ;;  %v238_v29 = vld [vmem:[%s1377_s28 + $0x88] sm:$0xff]  ;;  %v296_v30 = vadd.f32 %v240_v27, %v239_v26  ;;  %v243_v32 = vld [vmem:[%s1377_s28 + $0xb0] sm:$0xff] }
  0x58   : > { %279 = vadd.xlane.f32.xlu1 %v278_v12  ;;  %v293_v31 = vadd.f32 %v238_v29, %v237_v28  ;;  %v244_v33 = vld [vmem:[%s1377_s28 + $0xb8] sm:$0xff]  ;;  %v241_v34 = vld [vmem:[%s1377_s28 + $0xa0] sm:$0xff]  ;;  %v242_v35 = vld [vmem:[%s1377_s28 + $0xa8] sm:$0xff] }
  0x59   : > { %273 = vadd.xlane.f32.xlu0 %v272_v13  ;;  %v302_v36 = vadd.f32 %v244_v33, %v243_v32  ;;  %v299_v37 = vadd.f32 %v242_v35, %v241_v34  ;;  %v247_v38 = vld [vmem:[%s1377_s28 + $0xd0] sm:$0xff]  ;;  %v248_v39 = vld [vmem:[%s1377_s28 + $0xd8] sm:$0xff]  ;;  %v245_v40 = vld [vmem:[%s1377_s28 + $0xc0] sm:$0xff] }
  0x5a   : > { %v246_v41 = vld [vmem:[%s1377_s28 + $0xc8] sm:$0xff]  ;;  %v308_v42 = vadd.f32 %v248_v39, %v247_v38  ;;  %v251_v44 = vld [vmem:[%s1377_s28 + $0xf0] sm:$0xff]  ;;  %v252_v45 = vld [vmem:[%s1377_s28 + $0xf8] sm:$0xff] }
  0x5b   : > { %v305_v43 = vadd.f32 %v246_v41, %v245_v40  ;;  %v249_v46 = vld [vmem:[%s1377_s28 + $0xe0] sm:$0xff]  ;;  %v250_v47 = vld [vmem:[%s1377_s28 + $0xe8] sm:$0xff]  ;;  %v314_v48 = vadd.f32 %v252_v45, %v251_v44  ;;  %v256_v56 = vld [vmem:[#allocation2 + $0x18] sm:$0xff] }
  0x5c   : > { %285 = vadd.xlane.f32.xlu1 %v284_v18  ;;  %v311_v49 = vadd.f32 %v250_v47, %v249_v46  ;;  %v255_v50 = vld [vmem:[#allocation2 + $0x10] sm:$0xff]  ;;  %v253_v51 = vld [vmem:[#allocation2] sm:$0xff]  ;;  %v254_v57 = vld [vmem:[#allocation2 + $0x8] sm:$0xff] }
  0x5d   : > { %282 = vadd.xlane.f32.xlu0 %v281_v19  ;;  %v258_v62 = vld [vmem:[#allocation2 + $0x28] sm:$0xff]  ;;  %v257_v63 = vld [vmem:[#allocation2 + $0x20] sm:$0xff]  ;;  %v260_v4 = vld [vmem:[#allocation2 + $0x38] sm:$0xff] }
  0x5e   : > { %v259_v5 = vld [vmem:[#allocation2 + $0x30] sm:$0xff]  ;;  %v262_v10 = vld [vmem:[#allocation2 + $0x48] sm:$0xff]  ;;  %v261_v11 = vld [vmem:[#allocation2 + $0x40] sm:$0xff] }
  0x5f   : > { %v264_v16 = vld [vmem:[#allocation2 + $0x58] sm:$0xff]  ;;  %v263_v17 = vld [vmem:[#allocation2 + $0x50] sm:$0xff]  ;;  %v266_v22 = vld [vmem:[#allocation2 + $0x68] sm:$0xff] }
  0x60   : > { %291 = vadd.xlane.f32.xlu1 %v290_v24  ;;  %v265_v23 = vld [vmem:[#allocation2 + $0x60] sm:$0xff]  ;;  %v268_v28 = vld [vmem:[#allocation2 + $0x78] sm:$0xff]  ;;  %v267_v29 = vld [vmem:[#allocation2 + $0x70] sm:$0xff] }
  0x61   : > { %288 = vadd.xlane.f32.xlu0 %v287_v25 }
  0x64   : > { %297 = vadd.xlane.f32.xlu1 %v296_v30 }
  0x65   : > { %294 = vadd.xlane.f32.xlu0 %v293_v31 }
  0x68   : > { %303 = vadd.xlane.f32.xlu1 %v302_v36 }
  0x69   : > { %300 = vadd.xlane.f32.xlu0 %v299_v37 }
  0x6c   : > { %309 = vadd.xlane.f32.xlu1 %v308_v42 }
  0x6d   : > { %306 = vadd.xlane.f32.xlu0 %v305_v43 }
  0x70   : > { %315 = vadd.xlane.f32.xlu1 %v314_v48 }
  0x71   : > { %312 = vadd.xlane.f32.xlu0 %v311_v49 }
  0xe1   : > { %v277_v52 = vpop.xlane.xlu1 %276 }
  0xe2   : > { %v319_v53 = vadd.f32 %v277_v52, %v255_v50  ;;  %v271_v54 = vpop.xlane.xlu0 %270 }
  0xe3   : > { %v317_v55 = vadd.f32 %v271_v54, %v253_v51 }
  0xe4   : > { %336 = vst.msk [vmem:[#allocation2 + $0x10] sm:$0xff] %vm333_vm2, %v319_v53 }
  0xe5   : > { %334 = vst.msk [vmem:[#allocation2] sm:$0xff] %vm333_vm2, %v317_v55  ;;  %v280_v58 = vpop.xlane.xlu1 %279 }
  0xe6   : > { %v320_v59 = vadd.f32 %v280_v58, %v256_v56  ;;  %v274_v60 = vpop.xlane.xlu0 %273 }
  0xe7   : > { %v318_v61 = vadd.f32 %v274_v60, %v254_v57 }
  0xe8   : > { %337 = vst.msk [vmem:[#allocation2 + $0x18] sm:$0xff] %vm333_vm2, %v320_v59 }
  0xe9   : > { %335 = vst.msk [vmem:[#allocation2 + $0x8] sm:$0xff] %vm333_vm2, %v318_v61  ;;  %v286_v0 = vpop.xlane.xlu1 %285 }
  0xea   : > { %v322_v1 = vadd.f32 %v286_v0, %v258_v62  ;;  %v283_v2 = vpop.xlane.xlu0 %282 }
  0xeb   : > { %v321_v3 = vadd.f32 %v283_v2, %v257_v63 }
  0xec   : > { %339 = vst.msk [vmem:[#allocation2 + $0x28] sm:$0xff] %vm333_vm2, %v322_v1 }
  0xed   : > { %338 = vst.msk [vmem:[#allocation2 + $0x20] sm:$0xff] %vm333_vm2, %v321_v3  ;;  %v292_v6 = vpop.xlane.xlu1 %291 }
  0xee   : > { %v324_v7 = vadd.f32 %v292_v6, %v260_v4  ;;  %v289_v8 = vpop.xlane.xlu0 %288 }
  0xef   : > { %v323_v9 = vadd.f32 %v289_v8, %v259_v5 }
  0xf0   : > { %341 = vst.msk [vmem:[#allocation2 + $0x38] sm:$0xff] %vm333_vm2, %v324_v7 }
  0xf1   : > { %340 = vst.msk [vmem:[#allocation2 + $0x30] sm:$0xff] %vm333_vm2, %v323_v9  ;;  %v298_v12 = vpop.xlane.xlu1 %297 }
  0xf2   : > { %v326_v13 = vadd.f32 %v298_v12, %v262_v10  ;;  %v295_v14 = vpop.xlane.xlu0 %294 }
  0xf3   : > { %v325_v15 = vadd.f32 %v295_v14, %v261_v11 }
  0xf4   : > { %343 = vst.msk [vmem:[#allocation2 + $0x48] sm:$0xff] %vm333_vm2, %v326_v13 }
  0xf5   : > { %342 = vst.msk [vmem:[#allocation2 + $0x40] sm:$0xff] %vm333_vm2, %v325_v15  ;;  %v304_v18 = vpop.xlane.xlu1 %303 }
  0xf6   : > { %v328_v19 = vadd.f32 %v304_v18, %v264_v16  ;;  %v301_v20 = vpop.xlane.xlu0 %300 }
  0xf7   : > { %v327_v21 = vadd.f32 %v301_v20, %v263_v17 }
  0xf8   : > { %345 = vst.msk [vmem:[#allocation2 + $0x58] sm:$0xff] %vm333_vm2, %v328_v19 }
  0xf9   : > { %344 = vst.msk [vmem:[#allocation2 + $0x50] sm:$0xff] %vm333_vm2, %v327_v21  ;;  %v310_v24 = vpop.xlane.xlu1 %309 }
  0xfa   : > { %v330_v25 = vadd.f32 %v310_v24, %v266_v22  ;;  %v307_v26 = vpop.xlane.xlu0 %306 }
  0xfb   : > { %v329_v27 = vadd.f32 %v307_v26, %v265_v23  ;;  %353 = sbr.rel (%p874_p11) target bundleno = 374 (0x176), region = 44 }
  0xfc   : > { %347 = vst.msk [vmem:[#allocation2 + $0x68] sm:$0xff] %vm333_vm2, %v330_v25 }
  0xfd   : > { %346 = vst.msk [vmem:[#allocation2 + $0x60] sm:$0xff] %vm333_vm2, %v329_v27  ;;  %v316_v30 = vpop.xlane.xlu1 %315 }
  0xfe   : > { %v332_v31 = vadd.f32 %v316_v30, %v268_v28  ;;  %v313_v32 = vpop.xlane.xlu0 %312 }
  0xff   : > { %v331_v33 = vadd.f32 %v313_v32, %v267_v29 }
 0x100   : > { %349 = vst.msk [vmem:[#allocation2 + $0x78] sm:$0xff] %vm333_vm2, %v332_v31 }
 0x101   : > { %348 = vst.msk [vmem:[#allocation2 + $0x70] sm:$0xff] %vm333_vm2, %v331_v33 }
 0x102   : > { %v1459_v34 = vld [vmem:[%s1389_s30] sm:$0xff]  ;;  %v1462_v35 = vld [vmem:[%s1389_s30 + $0x8] sm:$0xff]  ;;  %v1465_v36 = vld [vmem:[%s1389_s30 + $0x10] sm:$0xff]  ;;  %vm681_vm3 = vcmask 0  }
 0x103   : > { %v1468_v37 = vld [vmem:[%s1389_s30 + $0x18] sm:$0xff]  ;;  %v1471_v38 = vld [vmem:[%s1389_s30 + $0x20] sm:$0xff]  ;;  %v1474_v39 = vld [vmem:[%s1389_s30 + $0x28] sm:$0xff]  ;;  %v386_v40 = vand.u32 2147483647, %v1459_v34 }
 0x104   : > { %v387_v41 = vand.u32 2147483647, %v1462_v35  ;;  %v1479_v42 = vld [vmem:[%s1389_s30 + $0x30] sm:$0xff]  ;;  %v388_v43 = vand.u32 2147483647, %v1465_v36  ;;  %v1485_v46 = vld [vmem:[%s1389_s30 + $0x38] sm:$0xff] }
 0x105   : > { %v389_v44 = vand.u32 2147483647, %v1468_v37  ;;  %v390_v45 = vand.u32 2147483647, %v1471_v38  ;;  %v1488_v47 = vld [vmem:[%s1389_s30 + $0x40] sm:$0xff]  ;;  %v1492_v49 = vld [vmem:[%s1389_s30 + $0x48] sm:$0xff] }
 0x106   : > { %v391_v48 = vand.u32 2147483647, %v1474_v39  ;;  %v1495_v50 = vld [vmem:[%s1389_s30 + $0x50] sm:$0xff]  ;;  %v392_v51 = vand.u32 2147483647, %v1479_v42  ;;  %v402_v52 = vsub.f32 0.0, %v386_v40 }
 0x107   : > { %v403_v53 = vsub.f32 0.0, %v387_v41  ;;  %v1499_v54 = vld [vmem:[%s1389_s30 + $0x58] sm:$0xff]  ;;  %v404_v55 = vsub.f32 0.0, %v388_v43  ;;  %v405_v56 = vsub.f32 0.0, %v389_v44  ;;  %v1502_v57 = vld [vmem:[%s1389_s30 + $0x60] sm:$0xff]  ;;  %v406_v60 = vsub.f32 0.0, %v390_v45 }
 0x108   : > { %v393_v58 = vand.u32 2147483647, %v1485_v46  ;;  %v394_v59 = vand.u32 2147483647, %v1488_v47  ;;  %v1507_v61 = vld [vmem:[%s1389_s30 + $0x68] sm:$0xff]  ;;  %v407_v0 = vsub.f32 0.0, %v391_v48 }
 0x109   : > { %v395_v62 = vand.u32 2147483647, %v1492_v49  ;;  %v396_v63 = vand.u32 2147483647, %v1495_v50  ;;  %v1512_v1 = vld [vmem:[%s1389_s30 + $0x70] sm:$0xff]  ;;  %v408_v2 = vsub.f32 0.0, %v392_v51 }
 0x10a   : > { %1809 = vst [vmem:[#allocation12_spill] sm:$0xff] %v1512_v1  ;;  %v418_v3 = vmul.f32 1.442695, %v402_v52  ;;  %v420_v4 = vmul.f32 1.442695, %v403_v53  ;;  %v1516_v8 = vld [vmem:[%s1389_s30 + $0x78] sm:$0xff] }
 0x10b   : > { %v397_v5 = vand.u32 2147483647, %v1499_v54  ;;  %v422_v6 = vmul.f32 1.442695, %v404_v55  ;;  %v424_v7 = vmul.f32 1.442695, %v405_v56 }
 0x10c   : > { %1810 = vst [vmem:[#allocation13_spill] sm:$0xff] %v1516_v8  ;;  %v398_v9 = vand.u32 2147483647, %v1502_v57  ;;  %v409_v10 = vsub.f32 0.0, %v393_v58  ;;  %979 = vpow2.f32 %v418_v3  ;;  %v426_v11 = vmul.f32 1.442695, %v406_v60 }
 0x10d   : > { %v410_v12 = vsub.f32 0.0, %v394_v59  ;;  %981 = vpow2.f32 %v420_v4  ;;  %v428_v13 = vmul.f32 1.442695, %v407_v0  ;;  %v399_v14 = vand.u32 2147483647, %v1507_v61  ;;  %v1522_v28 = vld [vmem:[#allocation2] sm:$0xff] }
 0x10e   : > { %v411_v15 = vsub.f32 0.0, %v395_v62  ;;  %983 = vpow2.f32 %v422_v6  ;;  %v430_v16 = vmul.f32 1.442695, %v408_v2  ;;  %v400_v17 = vand.u32 2147483647, %v1512_v1  ;;  %v1524_v29 = vld [vmem:[#allocation2 + $0x8] sm:$0xff] }
 0x10f   : > { %v401_v18 = vand.u32 2147483647, %v1516_v8  ;;  %v412_v19 = vsub.f32 0.0, %v396_v63  ;;  %985 = vpow2.f32 %v424_v7  ;;  %v413_v20 = vsub.f32 0.0, %v397_v5  ;;  %v1526_v33 = vld [vmem:[#allocation2 + $0x10] sm:$0xff]  ;;  %v1534_v48 = vld [vmem:[#allocation2 + $0x18] sm:$0xff] }
 0x110   : > { %v414_v21 = vsub.f32 0.0, %v398_v9  ;;  %987 = vpow2.f32 %v426_v11  ;;  %v432_v22 = vmul.f32 1.442695, %v409_v10  ;;  %v434_v23 = vmul.f32 1.442695, %v410_v12  ;;  %v1539_v60 = vld [vmem:[#allocation2 + $0x20] sm:$0xff] }
 0x111   : > { %989 = vpow2.f32 %v428_v13  ;;  %v415_v24 = vsub.f32 0.0, %v399_v14  ;;  %v436_v25 = vmul.f32 1.442695, %v411_v15  ;;  %v416_v26 = vsub.f32 0.0, %v400_v17  ;;  %v1545_v7 = vld [vmem:[#allocation2 + $0x28] sm:$0xff]  ;;  %v1551_v17 = vld [vmem:[#allocation2 + $0x30] sm:$0xff] }
 0x112   : > { %991 = vpow2.f32 %v430_v16  ;;  %v438_v27 = vmul.f32 1.442695, %v412_v19  ;;  %v417_v30 = vsub.f32 0.0, %v401_v18  ;;  %v440_v31 = vmul.f32 1.442695, %v413_v20 }
 0x113   : > { %993 = vpow2.f32 %v432_v22  ;;  %v442_v32 = vmul.f32 1.442695, %v414_v21  ;;  %v684_v40 = vsel %vm333_vm2, %v1522_v28, 0.0  ;;  %v685_v41 = vsel %vm333_vm2, %v1524_v29, 0.0 }
 0x114   : > { %995 = vpow2.f32 %v434_v23  ;;  %v687_v43 = vsel %vm333_vm2, %v1526_v33, 0.0  ;;  %v444_v45 = vmul.f32 1.442695, %v415_v24  ;;  %v686_v51 = vadd.f32 %v685_v41, %v684_v40  ;;  %v1612_v41 = vld [vmem:[#allocation2 + $0x50] sm:$0xff] }
 0x115   : > { %997 = vpow2.f32 %v436_v25  ;;  %v446_v53 = vmul.f32 1.442695, %v416_v26  ;;  %v689_v55 = vsel %vm333_vm2, %v1534_v48, 0.0  ;;  %v448_v59 = vmul.f32 1.442695, %v417_v30  ;;  %v1616_v30 = vld [vmem:[#allocation2 + $0x60] sm:$0xff] }
 0x116   : > { %v980_v44 = vpop.eup %979  ;;  %999 = vpow2.f32 %v438_v27  ;;  %v688_v62 = vadd.f32 %v687_v43, %v686_v51  ;;  %v691_v3 = vsel %vm333_vm2, %v1539_v60, 0.0  ;;  %v693_v13 = vsel %vm333_vm2, %v1545_v7, 0.0  ;;  %v1561_v43 = vld [vmem:[#allocation2 + $0x38] sm:$0xff]  ;;  %1812 = vst [vmem:[#allocation15_spill] sm:$0xff] %v1616_v30 }
 0x117   : > { %v982_v52 = vpop.eup %981  ;;  %1001 = vpow2.f32 %v440_v31  ;;  %v450_v2 = vadd.f32 1.0, %v980_v44  ;;  %v695_v21 = vsel %vm333_vm2, %v1551_v17, 0.0  ;;  %v1610_v51 = vmul.f32 -1.442695, %v1516_v8  ;;  %v1622_v8 = vld [vmem:[#allocation2 + $0x68] sm:$0xff] }
 0x118   : > { %v984_v56 = vpop.eup %983  ;;  %1003 = vpow2.f32 %v442_v32  ;;  %v451_v6 = vadd.f32 1.0, %v982_v52  ;;  %v690_v9 = vadd.f32 %v689_v55, %v688_v62  ;;  %v703_v23 = vsel %vm333_vm2, %v1612_v41, 0.0  ;;  %1813 = vst [vmem:[#allocation16_spill] sm:$0xff] %v1622_v8 }
 0x119   : > { %v986_v63 = vpop.eup %985  ;;  %1005 = vpow2.f32 %v444_v45  ;;  %v452_v12 = vadd.f32 1.0, %v984_v56  ;;  %v1601_v56 = vmul.f32 -1.442695, %v1502_v57 }
 0x11a   : > { %v988_v4 = vpop.eup %987  ;;  %1007 = vpow2.f32 %v446_v53  ;;  %v453_v16 = vadd.f32 1.0, %v986_v63  ;;  %v692_v18 = vadd.f32 %v691_v3, %v690_v9  ;;  %v697_v53 = vsel %vm333_vm2, %v1561_v43, 0.0 }
 0x11b   : > { %v990_v10 = vpop.eup %989  ;;  %1009 = vpow2.f32 %v448_v59  ;;  %v454_v20 = vadd.f32 1.0, %v988_v4  ;;  %v1598_v59 = vmul.f32 -1.442695, %v1499_v54 }
 0x11c   : > { %v992_v14 = vpop.eup %991  ;;  %1011 = vlog2.f32 %v450_v2  ;;  %v455_v24 = vadd.f32 1.0, %v990_v10  ;;  %v694_v25 = vadd.f32 %v693_v13, %v692_v18  ;;  %v875_v10 = vmul.f32 -1.442695, %v1459_v34  ;;  %v1572_v13 = vld [vmem:[#allocation2 + $0x40] sm:$0xff] }
 0x11d   : > { %v994_v22 = vpop.eup %993  ;;  %1013 = vlog2.f32 %v451_v6  ;;  %v456_v31 = vadd.f32 1.0, %v992_v14 }
 0x11e   : > { %v996_v26 = vpop.eup %995  ;;  %1015 = vlog2.f32 %v452_v12  ;;  %v696_v44 = vadd.f32 %v695_v21, %v694_v25  ;;  %v457_v52 = vadd.f32 1.0, %v994_v22  ;;  %v876_v12 = vmul.f32 -1.442695, %v1462_v35 }
 0x11f   : > { %v998_v32 = vpop.eup %997  ;;  %1017 = vlog2.f32 %v453_v16  ;;  %v458_v62 = vadd.f32 1.0, %v996_v26  ;;  %v699_v21 = vsel %vm333_vm2, %v1572_v13, 0.0  ;;  %v878_v25 = vmul.f32 -1.442695, %v1468_v37 }
 0x120   : > { %v1000_v45 = vpop.eup %999  ;;  %1019 = vlog2.f32 %v454_v20  ;;  %v459_v4 = vadd.f32 1.0, %v998_v32  ;;  %v698_v14 = vadd.f32 %v697_v53, %v696_v44  ;;  %v877_v20 = vmul.f32 -1.442695, %v1465_v36 }
 0x121   : > { %v1002_v55 = vpop.eup %1001  ;;  %1021 = vlog2.f32 %v455_v24  ;;  %v460_v9 = vadd.f32 1.0, %v1000_v45  ;;  %v879_v26 = vmul.f32 -1.442695, %v1471_v38  ;;  %v880_v44 = vmul.f32 -1.442695, %v1474_v39 }
 0x122   : > { %v1004_v63 = vpop.eup %1003  ;;  %1023 = vlog2.f32 %v456_v31  ;;  %v461_v18 = vadd.f32 1.0, %v1002_v55  ;;  %v881_v45 = vmul.f32 -1.442695, %v1479_v42  ;;  %v1582_v53 = vmul.f32 -1.442695, %v1485_v46 }
 0x123   : > { %v1006_v6 = vpop.eup %1005  ;;  %1025 = vlog2.f32 %v457_v52  ;;  %v462_v24 = vadd.f32 1.0, %v1004_v63  ;;  %v1585_v55 = vmul.f32 -1.442695, %v1488_v47  ;;  %v700_v63 = vadd.f32 %v699_v21, %v698_v14 }
 0x124   : > { %v1008_v16 = vpop.eup %1007  ;;  %1027 = vlog2.f32 %v458_v62  ;;  %v463_v32 = vadd.f32 1.0, %v1006_v6  ;;  %v1587_v62 = vld [vmem:[#allocation2 + $0x48] sm:$0xff]  ;;  %v1590_v6 = vmul.f32 -1.442695, %v1492_v49  ;;  %v1604_v14 = vmul.f32 -1.442695, %v1507_v61 }
 0x125   : > { %v1010_v22 = vpop.eup %1009  ;;  %1029 = vlog2.f32 %v459_v4  ;;  %v1593_v4 = vmul.f32 -1.442695, %v1495_v50  ;;  %v1607_v21 = vmul.f32 -1.442695, %v1512_v1 }
 0x126   : > { %v1012_v31 = vpop.eup %1011  ;;  %1031 = vlog2.f32 %v460_v9  ;;  %v701_v9 = vsel %vm333_vm2, %v1587_v62, 0.0 }
 0x127   : > { %v1014_v52 = vpop.eup %1013  ;;  %1033 = vlog2.f32 %v461_v18  ;;  %v702_v27 = vadd.f32 %v701_v9, %v700_v63  ;;  %v467_v15 = vmul.f32 0.6931472, %v1012_v31  ;;  %v464_v9 = vadd.f32 1.0, %v1008_v16 }
 0x128   : > { %v1016_v3 = vpop.eup %1015  ;;  %1035 = vlog2.f32 %v462_v24  ;;  %v1614_v24 = vld [vmem:[#allocation2 + $0x58] sm:$0xff]  ;;  %v469_v11 = vmul.f32 0.6931472, %v1014_v52  ;;  %v1816_v52 = vmin.f32 %v1459_v34, 0.0  ;;  %v1818_v16 = vmin.f32 %v1465_v36, 0.0 }
 0x129   : > { %v1018_v2 = vpop.eup %1017  ;;  %1037 = vlog2.f32 %v463_v32  ;;  %1811 = vst [vmem:[#allocation14_spill] sm:$0xff] %v1614_v24  ;;  %v705_v32 = vsel %vm333_vm2, %v1614_v24, 0.0  ;;  %v471_v5 = vmul.f32 0.6931472, %v1016_v3  ;;  %v1630_v24 = vsel %vm333_vm2, %v1622_v8, 0.0 }
 0x12a   : > { %v1020_v18 = vpop.eup %1019  ;;  %1039 = vpow2.f32 %v875_v10  ;;  %v473_v0 = vmul.f32 0.6931472, %v1018_v2  ;;  %v1626_v10 = vsel %vm333_vm2, %v1616_v30, 0.0  ;;  %1815 = vst [vmem:[#allocation18_spill] sm:$0xff] %v1630_v24  ;;  %v465_v3 = vadd.f32 1.0, %v1010_v22 }
 0x12b   : > { %v1022_v40 = vpop.eup %1021  ;;  %1041 = vpow2.f32 %v876_v12  ;;  %v475_v58 = vmul.f32 0.6931472, %v1020_v18  ;;  %1814 = vst [vmem:[#allocation17_spill] sm:$0xff] %v1626_v10  ;;  %v704_v2 = vadd.f32 %v703_v23, %v702_v27  ;;  %v498_v18 = vsub.f32 %v1816_v52, %v467_v15  ;;  %v1644_v27 = vld [vmem:[#allocation2 + $0x78] sm:$0xff] }
 0x12c   : > { %v1024_v19 = vpop.eup %1023  ;;  %1043 = vpow2.f32 %v877_v20  ;;  %v477_v1 = vmul.f32 0.6931472, %v1022_v40  ;;  %v1817_v30 = vmin.f32 %v1462_v35, 0.0  ;;  %v500_v40 = vsub.f32 %v1818_v16, %v471_v5 }
 0x12d   : > { %v1026_v63 = vpop.eup %1025  ;;  %1045 = vpow2.f32 %v878_v25  ;;  %v479_v12 = vmul.f32 0.6931472, %v1024_v19  ;;  %v1638_v25 = vld [vmem:[#allocation2 + $0x70] sm:$0xff]  ;;  %v1819_v24 = vmin.f32 %v1468_v37, 0.0  ;;  %v1820_v19 = vmin.f32 %v1471_v38, 0.0 }
 0x12e   : > { %v1028_v31 = vpop.eup %1027  ;;  %1047 = vpow2.f32 %v879_v26  ;;  %v499_v10 = vsub.f32 %v1817_v30, %v469_v11  ;;  %v1648_v34 = vsel %vm333_vm2, %v1638_v25, 0.0  ;;  %v481_v36 = vmul.f32 0.6931472, %v1026_v63 }
 0x12f   : > { %v1030_v20 = vpop.eup %1029  ;;  %1049 = vpow2.f32 %v880_v44  ;;  %v501_v22 = vsub.f32 %v1819_v24, %v473_v0  ;;  %v502_v23 = vsub.f32 %v1820_v19, %v475_v58  ;;  %v1821_v5 = vmin.f32 %v1474_v39, 0.0 }
 0x130   : > { %v1032_v8 = vpop.eup %1031  ;;  %1051 = vpow2.f32 %v881_v45  ;;  %v1654_v37 = vsel %vm333_vm2, %v1644_v27, 0.0  ;;  %v483_v38 = vmul.f32 0.6931472, %v1028_v31  ;;  %v1822_v58 = vmin.f32 %v1479_v42, 0.0 }
 0x131   : > { %v1034_v35 = vpop.eup %1033  ;;  %1053 = vlog2.f32 %v464_v9  ;;  %v503_v11 = vsub.f32 %v1821_v5, %v477_v1  ;;  %v1659_v30 = vadd.f32 %v705_v32, %v704_v2  ;;  %v627_v44 = vmul.f32 %v1522_v28, %v498_v18 }
 0x132   : > { %v1036_v0 = vpop.eup %1035  ;;  %v504_v15 = vsub.f32 %v1822_v58, %v479_v12  ;;  %1055 = vpow2.f32 %v1582_v53  ;;  %v628_v39 = vmul.f32 %v1524_v29, %v499_v10  ;;  %v629_v1 = vmul.f32 %v1526_v33, %v500_v40 }
 0x133   : > { %v1038_v26 = vpop.eup %1037  ;;  %1057 = vlog2.f32 %v465_v3  ;;  %v485_v24 = vmul.f32 0.6931472, %v1030_v20  ;;  %v630_v63 = vmul.f32 %v1534_v48, %v501_v22  ;;  %v631_v42 = vmul.f32 %v1539_v60, %v502_v23 }
 0x134   : > { %v1040_v45 = vpop.eup %1039  ;;  %1059 = vpow2.f32 %v1585_v55  ;;  %v487_v53 = vmul.f32 0.6931472, %v1032_v8  ;;  %v1823_v32 = vmin.f32 %v1485_v46, 0.0  ;;  %v632_v28 = vmul.f32 %v1545_v7, %v503_v11 }
 0x135   : > { %v1042_v9 = vpop.eup %1041  ;;  %1061 = vpow2.f32 %v1590_v6  ;;  %v1824_v33 = vmin.f32 %v1488_v47, 0.0  ;;  %v562_v55 = vadd.f32 1.0, %v1040_v45  ;;  %v633_v48 = vmul.f32 %v1551_v17, %v504_v15 }
 0x136   : > { %v505_v31 = vsub.f32 %v1823_v32, %v481_v36  ;;  %v1044_v29 = vpop.eup %1043  ;;  %1063 = vpow2.f32 %v1593_v4  ;;  %v489_v60 = vmul.f32 0.6931472, %v1034_v35  ;;  %v563_v8 = vadd.f32 1.0, %v1042_v9 }
 0x137   : > { %v506_v10 = vsub.f32 %v1824_v33, %v483_v38  ;;  %v1046_v3 = vpop.eup %1045  ;;  %1065 = vpow2.f32 %v1598_v59  ;;  %v643_v46 = vsel %vm333_vm2, %v627_v44, 0.0  ;;  %v1825_v6 = vmin.f32 %v1492_v49, 0.0 }
 0x138   : > { %v1048_v12 = vpop.eup %1047  ;;  %1067 = vpow2.f32 %v1601_v56  ;;  %v564_v47 = vadd.f32 1.0, %v1044_v29  ;;  %v644_v2 = vsel %vm333_vm2, %v628_v39, 0.0  ;;  %v565_v17 = vadd.f32 1.0, %v1046_v3 }
 0x139   : > { %v507_v7 = vsub.f32 %v1825_v6, %v485_v24  ;;  %v1050_v4 = vpop.eup %1049  ;;  %1069 = vpow2.f32 %v1604_v14  ;;  %v645_v20 = vadd.f32 %v644_v2, %v643_v46  ;;  %v646_v52 = vsel %vm333_vm2, %v629_v1, 0.0  ;;  %v1832_v46 = vld [vmem:[#allocation12_spill] sm:$0xff] }
 0x13a   : > { %v1052_v59 = vpop.eup %1051  ;;  %v566_v18 = vadd.f32 1.0, %v1048_v12  ;;  %1071 = vrcp.f32 %v562_v55  ;;  %v634_v16 = vmul.f32 %v1561_v43, %v505_v31  ;;  %v648_v49 = vsel %vm333_vm2, %v630_v63, 0.0 }
 0x13b   : > { %v1054_v40 = vpop.eup %1053  ;;  %v491_v22 = vmul.f32 0.6931472, %v1036_v0  ;;  %v567_v56 = vadd.f32 1.0, %v1050_v4  ;;  %1073 = vrcp.f32 %v563_v8  ;;  %v647_v19 = vadd.f32 %v646_v52, %v645_v20 }
 0x13c   : > { %v1056_v23 = vpop.eup %1055  ;;  %v1826_v35 = vmin.f32 %v1495_v50, 0.0  ;;  %1075 = vrcp.f32 %v564_v47  ;;  %v635_v36 = vmul.f32 %v1572_v13, %v506_v10  ;;  %v650_v5 = vsel %vm333_vm2, %v631_v42, 0.0  ;;  %v1830_v10 = vld [vmem:[#allocation17_spill] sm:$0xff] }
 0x13d   : > { %v1058_v11 = vpop.eup %1057  ;;  %v493_v38 = vmul.f32 0.6931472, %v1038_v26  ;;  %v568_v58 = vadd.f32 1.0, %v1052_v59  ;;  %1077 = vrcp.f32 %v565_v17  ;;  %v649_v43 = vadd.f32 %v648_v49, %v647_v19 }
 0x13e   : > { %v508_v14 = vsub.f32 %v1826_v35, %v487_v53  ;;  %v1060_v15 = vpop.eup %1059  ;;  %v1827_v0 = vmin.f32 %v1499_v54, 0.0  ;;  %1079 = vrcp.f32 %v566_v18  ;;  %v636_v39 = vmul.f32 %v1587_v62, %v507_v7  ;;  %v1834_v7 = vld [vmem:[#allocation15_spill] sm:$0xff]  ;;  %v1836_v35 = vld [vmem:[#allocation13_spill] sm:$0xff] }
 0x13f   : > { %v652_v50 = vsel %vm333_vm2, %v632_v28, 0.0  ;;  %v1062_v1 = vpop.eup %1061  ;;  %v495_v45 = vmul.f32 0.6931472, %v1054_v40  ;;  %v569_v24 = vadd.f32 1.0, %v1056_v23  ;;  %1081 = vrcp.f32 %v567_v56 }
 0x140   : > { %v509_v44 = vsub.f32 %v1827_v0, %v489_v60  ;;  %v651_v13 = vadd.f32 %v650_v5, %v649_v43  ;;  %v1064_v63 = vpop.eup %1063  ;;  %v1828_v26 = vmin.f32 %v1502_v57, 0.0  ;;  %1083 = vpow2.f32 %v1607_v21 }
 0x141   : > { %v637_v9 = vmul.f32 %v1612_v41, %v508_v14  ;;  %v654_v54 = vsel %vm333_vm2, %v633_v48, 0.0  ;;  %v1066_v53 = vpop.eup %1065  ;;  %v497_v32 = vmul.f32 0.6931472, %v1058_v11  ;;  %v570_v62 = vadd.f32 1.0, %v1060_v15  ;;  %v1831_v48 = vld [vmem:[#allocation14_spill] sm:$0xff] }
 0x142   : > { %v510_v42 = vsub.f32 %v1828_v26, %v491_v22  ;;  %1085 = vrcp.f32 %v568_v58  ;;  %v653_v31 = vadd.f32 %v652_v50, %v651_v13  ;;  %v1068_v28 = vpop.eup %1067  ;;  %v1829_v29 = vmin.f32 %v1507_v61, 0.0 }
 0x143   : > { %1087 = vpow2.f32 %v1610_v51  ;;  %v656_v57 = vsel %vm333_vm2, %v634_v16, 0.0  ;;  %v708_v21 = vadd.f32 %v1830_v10, %v1659_v30  ;;  %v1070_v55 = vpop.eup %1069  ;;  %v571_v41 = vadd.f32 1.0, %v1062_v1  ;;  %v1835_v51 = vld [vmem:[#allocation18_spill] sm:$0xff] }
 0x144   : > { %v511_v33 = vsub.f32 %v1829_v29, %v493_v38  ;;  %1089 = vrcp.f32 %v569_v24  ;;  %v638_v3 = vmul.f32 %v1831_v48, %v509_v44  ;;  %v655_v60 = vadd.f32 %v654_v54, %v653_v31  ;;  %v1072_v8 = vpop.eup %1071  ;;  %v1838_v44 = vld [vmem:[#allocation16_spill] sm:$0xff] }
 0x145   : > { %v1833_v12 = vmin.f32 %v1832_v46, 0.0  ;;  %v639_v61 = vmul.f32 %v1834_v7, %v510_v42  ;;  %v658_v47 = vsel %vm333_vm2, %v635_v36, 0.0  ;;  %v710_v2 = vadd.f32 %v1835_v51, %v708_v21  ;;  %v1074_v4 = vpop.eup %1073  ;;  %v683_v51 = vld [vmem:[#allocation4] sm:$0x1] }
 0x146   : > { %v572_v17 = vadd.f32 1.0, %v1064_v63  ;;  %1091 = vrcp.f32 %v570_v62  ;;  %v657_v30 = vadd.f32 %v656_v57, %v655_v60  ;;  %v724_v20 = vsel %vm333_vm2, %v1072_v8, 0.0  ;;  %v1076_v52 = vpop.eup %1075 }
 0x147   : > { %v512_v6 = vsub.f32 %v1833_v12, %v495_v45  ;;  %v573_v59 = vadd.f32 1.0, %v1066_v53  ;;  %v660_v18 = vsel %vm333_vm2, %v636_v39, 0.0  ;;  %v712_v16 = vadd.f32 %v1648_v34, %v710_v2  ;;  %v1078_v40 = vpop.eup %1077 }
 0x148   : > { %v725_v49 = vsel %vm333_vm2, %v1074_v4, 0.0  ;;  %1093 = vrcp.f32 %v571_v41  ;;  %v659_v22 = vadd.f32 %v658_v47, %v657_v30  ;;  %v727_v19 = vsel %vm333_vm2, %v1076_v52, 0.0  ;;  %v1080_v23 = vpop.eup %1079 }
 0x149   : > { %v726_v56 = vadd.f32 %v725_v49, %v724_v20  ;;  %v1837_v14 = vmin.f32 %v1836_v35, 0.0  ;;  %v662_v5 = vsel %vm333_vm2, %v637_v9, 0.0  ;;  %v714_v11 = vadd.f32 %v1654_v37, %v712_v16  ;;  %v1082_v58 = vpop.eup %1081 }
 0x14a   : > { %v729_v38 = vsel %vm333_vm2, %v1078_v40, 0.0  ;;  %v574_v34 = vadd.f32 1.0, %v1068_v28  ;;  %1095 = vrcp.f32 %v572_v17  ;;  %v661_v43 = vadd.f32 %v660_v18, %v659_v22  ;;  %v1084_v0 = vpop.eup %1083 }
 0x14b   : > { %v513_v36 = vsub.f32 %v1837_v14, %v497_v32  ;;  %v728_v15 = vadd.f32 %v727_v19, %v726_v56  ;;  %v640_v39 = vmul.f32 %v1838_v44, %v511_v33  ;;  %v664_v50 = vsel %vm333_vm2, %v638_v3, 0.0  ;;  %v626_v44 = vld [vmem:[#allocation3] sm:$0x1] }
 0x14c   : > { %v715_v1 = vrot.slane %v714_v11, 4  ;;  %v731_v45 = vsel %vm333_vm2, %v1080_v23, 0.0  ;;  %v1086_v24 = vpop.eup %1085  ;;  %v575_v13 = vadd.f32 1.0, %v1070_v55  ;;  %1097 = vrcp.f32 %v573_v59 }
 0x14d   : > { %v663_v63 = vadd.f32 %v662_v5, %v661_v43  ;;  %v730_v37 = vadd.f32 %v729_v38, %v728_v15  ;;  %v1088_v26 = vpop.eup %1087  ;;  %v641_v42 = vmul.f32 %v1638_v25, %v512_v6  ;;  %v666_v9 = vsel %vm333_vm2, %v639_v61, 0.0 }
 0x14e   : > { %v716_v54 = vadd.f32 %v715_v1, %v714_v11  ;;  %v733_v53 = vsel %vm333_vm2, %v1082_v58, 0.0  ;;  %v1090_v32 = vpop.eup %1089  ;;  %v576_v62 = vadd.f32 1.0, %v1084_v0  ;;  %1099 = vrcp.f32 %v574_v34 }
 0x14f   : > { %v665_v31 = vadd.f32 %v664_v50, %v663_v63  ;;  %v732_v28 = vadd.f32 %v731_v45, %v730_v37  ;;  %v642_v29 = vmul.f32 %v1644_v27, %v513_v36  ;;  %v668_v33 = vsel %vm333_vm2, %v640_v39, 0.0 }
 0x150   : > { %v717_v57 = vrot.slane %v716_v54, 2  ;;  %v735_v10 = vsel %vm333_vm2, %v1086_v24, 0.0  ;;  %v1092_v21 = vpop.eup %1091  ;;  %v577_v55 = vadd.f32 1.0, %v1088_v26  ;;  %1101 = vrcp.f32 %v575_v13 }
 0x151   : > { %v667_v25 = vadd.f32 %v666_v9, %v665_v31  ;;  %v734_v41 = vadd.f32 %v733_v53, %v732_v28  ;;  %v670_v48 = vsel %vm333_vm2, %v641_v42, 0.0  ;;  %v737_v60 = vsel %vm333_vm2, %v1090_v32, 0.0  ;;  %v723_v9 = vld [vmem:[#allocation5] sm:$0x1] }
 0x152   : > { %v718_v3 = vadd.f32 %v717_v57, %v716_v54  ;;  %v1094_v8 = vpop.eup %1093  ;;  %1103 = vrcp.f32 %v576_v62  ;;  %v672_v27 = vsel %vm333_vm2, %v642_v29, 0.0  ;;  %v739_v7 = vsel %vm333_vm2, %v1092_v21, 0.0 }
 0x153   : > { %v669_v46 = vadd.f32 %v668_v33, %v667_v25  ;;  %v736_v12 = vadd.f32 %v735_v10, %v734_v41  ;;  %1105 = vrcp.f32 %v577_v55  ;;  %v741_v17 = vsel %vm333_vm2, %v1094_v8, 0.0 }
 0x154   : > { %v719_v6 = vrot.slane %v718_v3, 1  ;;  %v1096_v61 = vpop.eup %1095 }
 0x155   : > { %v671_v47 = vadd.f32 %v670_v48, %v669_v46  ;;  %v738_v2 = vadd.f32 %v737_v60, %v736_v12  ;;  %v743_v18 = vsel %vm333_vm2, %v1096_v61, 0.0 }
 0x156   : > { %v720_v4 = vadd.f32 %v719_v6, %v718_v3  ;;  %v1098_v30 = vpop.eup %1097 }
 0x157   : > { %v673_v20 = vadd.f32 %v672_v27, %v671_v47  ;;  %v740_v52 = vadd.f32 %v739_v7, %v738_v2  ;;  %v745_v22 = vsel %vm333_vm2, %v1098_v30, 0.0 }
 0x158   : > { %v721_v59 = vadd.f32 %v720_v4, %v683_v51  ;;  %v1100_v16 = vpop.eup %1099 }
 0x159   : > { %v674_v49 = vrot.slane %v673_v20, 4  ;;  %v742_v40 = vadd.f32 %v741_v17, %v740_v52  ;;  %v747_v35 = vsel %vm333_vm2, %v1100_v16, 0.0 }
 0x15a   : > { %722 = vst.msk [vmem:[#allocation4] sm:$0x1] %vm681_vm3, %v721_v59  ;;  %v1102_v56 = vpop.eup %1101 }
 0x15b   : > { %v675_v19 = vadd.f32 %v674_v49, %v673_v20  ;;  %v744_v23 = vadd.f32 %v743_v18, %v742_v40  ;;  %v749_v11 = vsel %vm333_vm2, %v1102_v56, 0.0 }
 0x15c   : > { %v1104_v14 = vpop.eup %1103 }
 0x15d   : > { %v676_v36 = vrot.slane %v675_v19, 2  ;;  %v746_v5 = vadd.f32 %v745_v22, %v744_v23  ;;  %v1106_v38 = vpop.eup %1105  ;;  %v751_v43 = vsel %vm333_vm2, %v1104_v14, 0.0 }
 0x15e   : > { %v753_v39 = vsel %vm333_vm2, %v1106_v38, 0.0 }
 0x15f   : > { %v677_v58 = vadd.f32 %v676_v36, %v675_v19  ;;  %v748_v34 = vadd.f32 %v747_v35, %v746_v5 }
 0x161   : > { %v678_v15 = vrot.slane %v677_v58, 1  ;;  %v750_v0 = vadd.f32 %v749_v11, %v748_v34 }
 0x163   : > { %v679_v50 = vadd.f32 %v678_v15, %v677_v58  ;;  %v752_v1 = vadd.f32 %v751_v43, %v750_v0 }
 0x165   : > { %v680_v45 = vadd.f32 %v679_v50, %v626_v44  ;;  %v754_v24 = vadd.f32 %v753_v39, %v752_v1 }
 0x167   : > { %682 = vst.msk [vmem:[#allocation3] sm:$0x1] %vm681_vm3, %v680_v45  ;;  %v755_v13 = vrot.slane %v754_v24, 4 }
 0x169   : > { %v756_v63 = vadd.f32 %v755_v13, %v754_v24 }
 0x16b   : > { %v757_v37 = vrot.slane %v756_v63, 2 }
 0x16d   : > { %v758_v26 = vadd.f32 %v757_v37, %v756_v63 }
 0x16f   : > { %v759_v42 = vrot.slane %v758_v26, 1 }
 0x171   : > { %v760_v54 = vadd.f32 %v759_v42, %v758_v26 }
 0x173   : > { %v761_v53 = vadd.f32 %v760_v54, %v723_v9 }
 0x175   : > { %762 = vst.msk [vmem:[#allocation5] sm:$0x1] %vm681_vm3, %v761_v53 }
 0x176 PF: > { %p763_p13 = scmp.eq.s32.totalorder %s1223_s13, 2 }
 0x178   : > { %p764_p1 = pnand %p763_p13, %p350_p9 }
 0x179   : > { %v769_v31 = vld [vmem:[#allocation4] sm:$0x1] (!%p764_p1)  ;;  %v768_v29 = vld [vmem:[#allocation3] sm:$0x1] (!%p764_p1)  ;;  %vm775_vm4 = vcmask (!%p764_p1), 0  }
 0x17a   : > { %767 = sbr.rel (%p764_p1) target bundleno = 399 (0x18f), region = 48 }
 0x17c   : > { %v770_v32 = vld [vmem:[#allocation5] sm:$0x1] (!%p764_p1) }
 0x17d   : > { %1107 = vlog2.f32 (!%p764_p1), %v770_v32 }
 0x187   : > { %v1108_v62 = vpop.eup %1107 }
 0x188   : > { %v772_v28 = vmul.f32 0.6931472, %v1108_v62 }
 0x18a   : > { %v773_v33 = vmul.f32 %v772_v28, %v769_v31 }
 0x18c   : > { %v774_v57 = vsub.f32 %v768_v29, %v773_v33 }
 0x18e   : > { %776 = vst.msk [vmem:[#allocation9] sm:$0x1] %vm775_vm4, %v774_v57 }
 0x18f PF: > { %p1748_p2 = scmp.eq.s32.totalorder %s861_s17, 11  ;;  %s1243_s12 = smov [#allocation9]  }
 0x190   : > { %s784_s13 = sshll.u32 %s1243_s12, 4  ;;  %s785_s13 = int_to_ptr.vmem [resolvable:$true] %s784_s13 }
 0x191   : > { %s1139_s26 = scalar_lea.vmem %s785_s13, 16  ;;  %s1145_s3 = scalar_lea.vmem %s785_s13, 32 }
 0x192   : > { %p1140_p3 = scmp.ne.s32.totalorder %s785_s13, %s1139_s26  ;;  %p1146_p4 = scmp.lt.s32.totalorder %s785_s13, %s785_s13 }
 0x193   : > { %p1147_p10 = scmp.lt.s32.totalorder %s1145_s3, %s1139_s26 }
 0x194   : > { %p1141_p12 = pnand %p1140_p3, %p1748_p2 }
 0x195   : > { %p1148_p5 = por %p1147_p10, %p1146_p4 }
 0x196   : > { %p1142_p0 = pneg %p1141_p12 }
 0x198   : > { %p1149_p6 = pnand %p1148_p5, %p1142_p0 }
 0x19a   : > { %1152 = shalt.err (!%p1149_p6)
}
 0x19b   : > { %s1153_s6 = scalar_lea.hbm %s1800_s2, 16 }
 0x19c   : > { %p1154_p8 = scmp.ne.s32.totalorder %s1800_s2, %s1153_s6  ;;  %p1159_p11 = scmp.lt.u32.totalorder %s1153_s6, %s1800_s2 }
 0x19e   : > { %p1155_p7 = pnand %p1154_p8, %p1748_p2 }
 0x1a0   : > { %p1156_p9 = pneg %p1155_p7 }
 0x1a2   : > { %p1161_p13 = pnand %p1159_p11, %p1156_p9 }
 0x1a4   : > { %1164 = shalt.err (!%p1161_p13)
}
 0x1a5   : > { %899 = dma.vmem_to_hbm [thread:$0]  (%p1748_p2), %s785_s13, 16, %s1800_s2, [#allocation8]  }
 0x1a6   : > { %1202 = dma.done.wait (%p1748_p2), [#allocation8], 16  }
 0x1a7   : > { %1204 = vsyncadd (%p1748_p2), [#allocation8], 4294967280 }
 0x1a8 PF: > { %s16_s16 = sadd.s32 1, %s1235_s16   ;;  %s1840_s9 = smov %s1211_s10 }
 0x1a9   : > { %p13_p1 = scmp.ge.s32.totalorder %s16_s16, 14   ;;  %s1841_s10 = smov %s1215_s11 }
 0x1aa   : > { %s1842_s11 = smov %s1328_s29  ;;  %s1843_s12 = smov %s1227_s14 }
 0x1ab   : > { %s1844_s13 = smov %s1231_s15  ;;  %s1845_s14 = smov %s1848_s18 }
 0x1ac   : > { %s1846_s15 = smov %s1852_s19  ;;  %15 = sbr.rel (!%p13_p1) target bundleno = 6 (0x6), region = 84 }
 0x1b3   :  { %797 = vsyncpa [#allocation7], 1 }
 0x1b4   :  { %799 = vsyncpa [#allocation7 + $0x1], 1 }
 0x1b5   :  { %800 = vsyncpa [#allocation8], 1 }
 0x1b6   :  { %802 = vsyncpa [#allocation8 + $0x1], 1 }

</bundles_post_ra>
